<compile_context>
chip_gen: v7x
topology: tpu7x:2x2x1
jax: 0.10.0
libtpu: 0.0.40
codegen_flags: <defaults>
</compile_context>

<pallas_src>
import functools

import jax
import jax.numpy as jnp
import numpy as np
from jax.experimental import pallas as pl
from jax.experimental.pallas import tpu as pltpu


def _round_up(n, m):
    return ((n + m - 1) // m) * m


def _cdiv(a, b):
    return (a + b - 1) // b


# Only force >= 2 grid steps (for v7x megacore sharding) above this many rows,
# so small batches keep a single, overhead-free grid step.
_MIN_SPLIT_BATCH = 1024


def _choose_batch_tile(B, block_b):
    # Keep the (8, 128) block constraint regardless of caller-supplied block_b.
    block_b = max(8, _round_up(block_b, 8))
    tb = min(block_b, _round_up(B, 8))
    # v7x has 2 TensorCores; with grid=(1,) the second core is idle.  When the
    # batch is large enough, cap the tile so the "parallel" axis has >= 2 steps.
    if B >= _MIN_SPLIT_BATCH and _cdiv(B, tb) < 2:
        tb = _round_up(_cdiv(B, 2), 8)
    return tb


def encoder_kernel(x_ref, w1_ref, b1_ref, w2_ref, b2_ref, wout_ref, out_ref,
                   *, in_dim):
    # One batch tile of x; slice y / qdot with static slices (VMEM views).
    x = x_ref[...]                                      # [TB, x_dim]
    y = x[:, :in_dim]                                   # [TB, x_dim - q_dim]
    q = x[:, in_dim:]                                   # [TB, q_dim]

    h1 = jnp.dot(y, w1_ref[...],
                 preferred_element_type=jnp.float32) + b1_ref[...]
    h1 = jnp.maximum(h1, 0.0)                           # relu
    h2 = jnp.dot(h1, w2_ref[...],
                 preferred_element_type=jnp.float32) + b2_ref[...]
    h2 = jnp.maximum(h2, 0.0)                           # relu
    z = jnp.dot(h2, wout_ref[...],
                preferred_element_type=jnp.float32)     # [TB, q_dim] (no bias)

    # Single full-tile store of the concatenated result.
    out_ref[...] = jnp.concatenate([z, q], axis=1)


def encoder_forward(x, params, *, x_dim, q_dim, block_b=4096):
    """Pallas equivalent of Encoder.forward (float32 output)."""
    w1, b1, w2, b2, wout = params
    in_dim = x_dim - q_dim
    hid = w1.shape[1]

    x = x.astype(jnp.float32)
    B = x.shape[0]

    tb = _choose_batch_tile(B, block_b)
    grid = (_cdiv(B, tb),)          # ragged last block handled by Pallas

    kernel = functools.partial(encoder_kernel, in_dim=in_dim)

    out = pl.pallas_call(
        kernel,
        out_shape=jax.ShapeDtypeStruct((B, 2 * q_dim), jnp.float32),
        grid_spec=pltpu.PrefetchScalarGridSpec(
            num_scalar_prefetch=0,
            grid=grid,
            in_specs=[
                # x: tiled over batch, full feature width on the lane axis.
                pl.BlockSpec((tb, x_dim), lambda i: (i, 0)),
                # Weights / biases: constant block index -> resident in VMEM,
                # DMA'd once across the whole grid.
                pl.BlockSpec((in_dim, hid), lambda i: (0, 0)),
                pl.BlockSpec((1, hid), lambda i: (0, 0)),
                pl.BlockSpec((hid, hid), lambda i: (0, 0)),
                pl.BlockSpec((1, hid), lambda i: (0, 0)),
                pl.BlockSpec((hid, q_dim), lambda i: (0, 0)),
            ],
            out_specs=pl.BlockSpec((tb, 2 * q_dim), lambda i: (i, 0)),
        ),
        compiler_params=pltpu.CompilerParams(
            dimension_semantics=("parallel",)),
    )(x, w1, b1, w2, b2, wout)
    return out


def init_params(key, x_dim, q_dim, hid_units):
    """Deterministic parameter init (shapes match the nn.Linear layers)."""
    in_dim = x_dim - q_dim
    k1, k2, k3, k4, k5 = jax.random.split(key, 5)
    # Weights stored already transposed: [in_features, out_features].
    w1 = jax.random.uniform(k1, (in_dim, hid_units), jnp.float32,
                            -1.0 / np.sqrt(in_dim), 1.0 / np.sqrt(in_dim))
    b1 = jax.random.uniform(k2, (1, hid_units), jnp.float32,
                            -1.0 / np.sqrt(in_dim), 1.0 / np.sqrt(in_dim))
    w2 = jax.random.uniform(k3, (hid_units, hid_units), jnp.float32,
                            -1.0 / np.sqrt(hid_units), 1.0 / np.sqrt(hid_units))
    b2 = jax.random.uniform(k4, (1, hid_units), jnp.float32,
                            -1.0 / np.sqrt(hid_units), 1.0 / np.sqrt(hid_units))
    wout = jax.random.uniform(k5, (hid_units, q_dim), jnp.float32,
                              -1.0 / np.sqrt(hid_units),
                              1.0 / np.sqrt(hid_units))
    return (w1, b1, w2, b2, wout)


def reference_forward(x, params, *, x_dim, q_dim):
    """Plain-JAX reference for correctness check."""
    w1, b1, w2, b2, wout = params
    x = x.astype(jnp.float32)
    y = x[:, : x_dim - q_dim]
    qdot = x[:, x_dim - q_dim:]
    h1 = jax.nn.relu(y @ w1 + b1)
    h2 = jax.nn.relu(h1 @ w2 + b2)
    return jnp.concatenate([h2 @ wout, qdot], axis=1)


if __name__ == "__main__":
    x_dim, q_dim, hid_units = 24, 8, 32
    key = jax.random.PRNGKey(0)
    kx, kp, kx2, kx3 = jax.random.split(key, 4)
    params = init_params(kp, x_dim, q_dim, hid_units)

    # 1) Small batch: single grid step, block covers the whole (tiny) batch.
    batch = 8
    x = jax.random.normal(kx, (batch, x_dim), jnp.float32)
    out = jax.block_until_ready(
        encoder_forward(x, params, x_dim=x_dim, q_dim=q_dim))
    ref = reference_forward(x, params, x_dim=x_dim, q_dim=q_dim)
    np.testing.assert_allclose(np.asarray(out), np.asarray(ref),
                               rtol=1e-5, atol=1e-5)

    # 2) Ragged batch with a small explicit tile: exercises the cdiv grid and
    #    the partial-final-block path (no jnp.pad copy of x).
    batch2 = 300
    x2 = jax.random.normal(kx2, (batch2, x_dim), jnp.float32)
    out2 = jax.block_until_ready(
        encoder_forward(x2, params, x_dim=x_dim, q_dim=q_dim, block_b=128))
    ref2 = reference_forward(x2, params, x_dim=x_dim, q_dim=q_dim)
    np.testing.assert_allclose(np.asarray(out2), np.asarray(ref2),
                               rtol=1e-5, atol=1e-5)

    # 3) Batch large enough that the tile is capped to give >= 2 grid steps
    #    (lets the "parallel" axis shard across both TensorCores on v7x).
    batch3 = 2048
    x3 = jax.random.normal(kx3, (batch3, x_dim), jnp.float32)
    out3 = jax.block_until_ready(
        encoder_forward(x3, params, x_dim=x_dim, q_dim=q_dim))
    ref3 = reference_forward(x3, params, x_dim=x_dim, q_dim=q_dim)
    np.testing.assert_allclose(np.asarray(out3), np.asarray(ref3),
                               rtol=1e-5, atol=1e-5)

    print("KERNEL_OK")
</pallas_src>

<mosaic_0001>
module attributes {stable_mosaic.version = 11 : i64} {
  func.func @encoder_kernel(%arg0: i32, %arg1: memref<8x24xf32, #tpu.memory_space<vmem>>, %arg2: memref<16x32xf32, #tpu.memory_space<vmem>>, %arg3: memref<1x32xf32, #tpu.memory_space<vmem>>, %arg4: memref<32x32xf32, #tpu.memory_space<vmem>>, %arg5: memref<1x32xf32, #tpu.memory_space<vmem>>, %arg6: memref<32x8xf32, #tpu.memory_space<vmem>>, %arg7: memref<8x16xf32, #tpu.memory_space<vmem>>) attributes {dimension_semantics = [#tpu.dimension_semantics<parallel>], iteration_bounds = array<i64: 1>, scalar_prefetch = 0 : i64, scratch_operands = 0 : i64, tpu.core_type = #tpu.core_type<tc>, window_params = [{transform_indices = @transform_0, window_bounds = array<i64: 8, 24>}, {pipeline_mode = #tpu.pipeline_mode<synchronous>, transform_indices = @transform_1, window_bounds = array<i64: 16, 32>}, {pipeline_mode = #tpu.pipeline_mode<synchronous>, transform_indices = @transform_2, window_bounds = array<i64: 1, 32>}, {pipeline_mode = #tpu.pipeline_mode<synchronous>, transform_indices = @transform_3, window_bounds = array<i64: 32, 32>}, {pipeline_mode = #tpu.pipeline_mode<synchronous>, transform_indices = @transform_4, window_bounds = array<i64: 1, 32>}, {pipeline_mode = #tpu.pipeline_mode<synchronous>, transform_indices = @transform_5, window_bounds = array<i64: 32, 8>}, {transform_indices = @transform_6, window_bounds = array<i64: 8, 16>}]} {
    %c0 = arith.constant 0 : index
    %c0_0 = arith.constant 0 : index
    %0 = vector.load %arg1[%c0, %c0_0] : memref<8x24xf32, #tpu.memory_space<vmem>>, vector<8x24xf32>
    %1 = vector.extract_strided_slice %0 {offsets = [0, 0], sizes = [8, 16], strides = [1, 1]} : vector<8x24xf32> to vector<8x16xf32>
    %2 = vector.extract_strided_slice %0 {offsets = [0, 16], sizes = [8, 8], strides = [1, 1]} : vector<8x24xf32> to vector<8x8xf32>
    %c0_1 = arith.constant 0 : index
    %c0_2 = arith.constant 0 : index
    %3 = vector.load %arg2[%c0_1, %c0_2] : memref<16x32xf32, #tpu.memory_space<vmem>>, vector<16x32xf32>
    %cst = arith.constant dense<0.000000e+00> : vector<8x32xf32>
    %4 = tpu.matmul %1, %3, %cst {dimension_numbers = #tpu.dot_dimension_numbers<[1], [0], [0], [1], [0, 0, 1, 1], [], []>} : vector<8x16xf32>, vector<16x32xf32>, vector<8x32xf32> -> vector<8x32xf32>
    %c0_3 = arith.constant 0 : index
    %c0_4 = arith.constant 0 : index
    %5 = vector.load %arg3[%c0_3, %c0_4] : memref<1x32xf32, #tpu.memory_space<vmem>>, vector<1x32xf32>
    %6 = vector.broadcast %5 : vector<1x32xf32> to vector<8x32xf32>
    %7 = arith.addf %4, %6 : vector<8x32xf32>
    %cst_5 = arith.constant 0.000000e+00 : f32
    %8 = vector.broadcast %cst_5 : f32 to vector<8x32xf32>
    %9 = arith.maximumf %7, %8 : vector<8x32xf32>
    %c0_6 = arith.constant 0 : index
    %c0_7 = arith.constant 0 : index
    %10 = vector.load %arg4[%c0_6, %c0_7] : memref<32x32xf32, #tpu.memory_space<vmem>>, vector<32x32xf32>
    %cst_8 = arith.constant dense<0.000000e+00> : vector<8x32xf32>
    %11 = tpu.matmul %9, %10, %cst_8 {dimension_numbers = #tpu.dot_dimension_numbers<[1], [0], [0], [1], [0, 0, 1, 1], [], []>} : vector<8x32xf32>, vector<32x32xf32>, vector<8x32xf32> -> vector<8x32xf32>
    %c0_9 = arith.constant 0 : index
    %c0_10 = arith.constant 0 : index
    %12 = vector.load %arg5[%c0_9, %c0_10] : memref<1x32xf32, #tpu.memory_space<vmem>>, vector<1x32xf32>
    %13 = vector.broadcast %12 : vector<1x32xf32> to vector<8x32xf32>
    %14 = arith.addf %11, %13 : vector<8x32xf32>
    %cst_11 = arith.constant 0.000000e+00 : f32
    %15 = vector.broadcast %cst_11 : f32 to vector<8x32xf32>
    %16 = arith.maximumf %14, %15 : vector<8x32xf32>
    %c0_12 = arith.constant 0 : index
    %c0_13 = arith.constant 0 : index
    %17 = vector.load %arg6[%c0_12, %c0_13] : memref<32x8xf32, #tpu.memory_space<vmem>>, vector<32x8xf32>
    %cst_14 = arith.constant dense<0.000000e+00> : vector<8x8xf32>
    %18 = tpu.matmul %16, %17, %cst_14 {dimension_numbers = #tpu.dot_dimension_numbers<[1], [0], [0], [1], [0, 0, 1, 1], [], []>} : vector<8x32xf32>, vector<32x8xf32>, vector<8x8xf32> -> vector<8x8xf32>
    %19 = tpu.concatenate %18, %2 in 1 : vector<8x8xf32>, vector<8x8xf32> -> vector<8x16xf32>
    %c0_15 = arith.constant 0 : index
    %c0_16 = arith.constant 0 : index
    %20 = vector.load %arg7[%c0_15, %c0_16] : memref<8x16xf32, #tpu.memory_space<vmem>>, vector<8x16xf32>
    tpu.vector_store %arg7[%c0_15, %c0_16], %19 {strides = array<i32>} : memref<8x16xf32, #tpu.memory_space<vmem>>, vector<8x16xf32>,
    return
  }
  func.func @transform_0(%arg0: i32) -> (i32, i32) {
    %c0_i32 = arith.constant 0 : i32
    %c0_i32_0 = arith.constant 0 : i32
    return %arg0, %c0_i32 : i32, i32
  }
  func.func @transform_1(%arg0: i32) -> (i32, i32) {
    %c0_i32 = arith.constant 0 : i32
    %c0_i32_0 = arith.constant 0 : i32
    %c0_i32_1 = arith.constant 0 : i32
    return %c0_i32, %c0_i32_0 : i32, i32
  }
  func.func @transform_2(%arg0: i32) -> (i32, i32) {
    %c0_i32 = arith.constant 0 : i32
    %c0_i32_0 = arith.constant 0 : i32
    %c0_i32_1 = arith.constant 0 : i32
    return %c0_i32, %c0_i32_0 : i32, i32
  }
  func.func @transform_3(%arg0: i32) -> (i32, i32) {
    %c0_i32 = arith.constant 0 : i32
    %c0_i32_0 = arith.constant 0 : i32
    %c0_i32_1 = arith.constant 0 : i32
    return %c0_i32, %c0_i32_0 : i32, i32
  }
  func.func @transform_4(%arg0: i32) -> (i32, i32) {
    %c0_i32 = arith.constant 0 : i32
    %c0_i32_0 = arith.constant 0 : i32
    %c0_i32_1 = arith.constant 0 : i32
    return %c0_i32, %c0_i32_0 : i32, i32
  }
  func.func @transform_5(%arg0: i32) -> (i32, i32) {
    %c0_i32 = arith.constant 0 : i32
    %c0_i32_0 = arith.constant 0 : i32
    %c0_i32_1 = arith.constant 0 : i32
    return %c0_i32, %c0_i32_0 : i32, i32
  }
  func.func @transform_6(%arg0: i32) -> (i32, i32) {
    %c0_i32 = arith.constant 0 : i32
    %c0_i32_0 = arith.constant 0 : i32
    return %arg0, %c0_i32 : i32, i32
  }
}

</mosaic_0001>

<bundles_post_ra>
// kernel: tpu_custom_call.1
= control target key start
LH: loop header
LB: loop body
LE: loop exit
PB: predicated region body
PF: predicated region fallthrough
CT: control target
= control target key end

     0   :  { %11 = vsyncpa [#allocation3], 0  ;;  %s527_s0 = inlined_call_operand.hbm [shape: f32[8,24], index: 0, kind: input, shape index: {}]   ;;  %s528_s1 = inlined_call_operand.vmem [shape: f32[16,32], index: 1, kind: input, shape index: {}]   ;;  %s529_s2 = inlined_call_operand.vmem [shape: f32[1,32], index: 2, kind: input, shape index: {}]   ;;  %s530_s3 = inlined_call_operand.vmem [shape: f32[32,32], index: 3, kind: input, shape index: {}]   ;;  %s531_s4 = inlined_call_operand.vmem [shape: f32[1,32], index: 4, kind: input, shape index: {}]   ;;  %s532_s5 = inlined_call_operand.vmem [shape: f32[32,8], index: 5, kind: input, shape index: {}]   ;;  %s533_s6 = inlined_call_operand.hbm [shape: f32[8,16], index: 6, kind: output, shape index: {}]  }
   0x1   :  { %12 = vsyncpa [#allocation4], 0  ;;  %s421_s21 = smov [#allocation2]   ;;  %s373_s25 = scalar_lea.hbm %s527_s0, 128 }
   0x2   :  { %s19_s22 = sshll.u32 %s421_s21, 4  ;;  %p374_p0 = scmp.ne.s32.totalorder %s527_s0, %s373_s25  ;;  %s20_s22 = int_to_ptr.vmem [resolvable:$true] %s19_s22 }
   0x3   :  { %p377_p1 = scmp.lt.u32.totalorder %s373_s25, %s527_s0 }
   0x5   :  { %p379_p2 = pnand %p377_p1, %p374_p0 }
   0x7   :  { %382 = shalt.err (!%p379_p2)
}
   0x8   :  { %s383_s30 = scalar_lea.vmem %s20_s22, 128  ;;  %p388_p4 = scmp.lt.s32.totalorder %s20_s22, %s20_s22 }
   0x9   :  { %p384_p3 = scmp.ne.s32.totalorder %s20_s22, %s383_s30  ;;  %p389_p5 = scmp.lt.s32.totalorder %s383_s30, %s383_s30 }
   0xb   :  { %p390_p6 = por %p389_p5, %p388_p4 }
   0xd   :  { %p391_p7 = pnand %p390_p6, %p384_p3 }
   0xf   :  { %394 = shalt.err (!%p391_p7)
}
  0x10   :  { %22 = dma.hbm_to_vmem [thread:$0]  %s527_s0, 128, %s20_s22, [#allocation3]  }
  0x11   :  { %417 = dma.done.wait [#allocation3], 128  }
  0x12   :  { %418 = vsyncadd [#allocation3], 4294967168  ;;  %v422_v0 = vmov 0.0|0.0   ;;  %vm423_vm0 = vmmov 0   ;;  %v424_v1 = vmov 0.0   ;;  %v37_v2 = vld [vmem:[%s528_s1] sm:$0xff] }
  0x13   :  { %352 = vmatprep.subr.bf16.mxu0 %v422_v0  ;;  %327 = vmatprep.mubr.msk.f32.mxu0 %vm423_vm0, %v424_v1  ;;  %v38_v3 = vld [vmem:[%s528_s1 + $0x8] sm:$0xff]  ;;  %v121_v5 = vld [vmem:[%s530_s3] sm:$0xff]  ;;  %vm46_vm1 = vcmask 130048   ;;  %v123_v9 = vld [vmem:[%s530_s3 + $0x10] sm:$0xff]  ;;  %vm132_vm2 = vcmask 261120   ;;  %s425_s28 = smov 120  }
  0x14   :  { %355 = vmatprep.subr.bf16.mxu1 %v422_v0  ;;  %338 = vmatprep.mubr.msk.f32.mxu1 %vm423_vm0, %v424_v1  ;;  %v353_v4 = vpack.c.bf16 %v38_v3, %v37_v2  ;;  %v122_v6 = vld [vmem:[%s530_s3 + $0x8] sm:$0xff]  ;;  %v36_v8 = vld [vmem:[#allocation2] sm:$0xff]  ;;  %v124_v10 = vld [vmem:[%s530_s3 + $0x18] sm:$0xff]  ;;  %s426_s30 = smov [#allocation5]   ;;  %vm287_vm3 = vcmask 64512  }
  0x15   :  { %v356_v7 = vpack.c.bf16 %v122_v6, %v121_v5  ;;  %v359_v11 = vpack.c.bf16 %v124_v10, %v123_v9  ;;  %v207_v12 = vld [vmem:[%s532_s5] sm:$0xff]  ;;  %v208_v13 = vld [vmem:[%s532_s5 + $0x8] sm:$0xff]  ;;  %v209_v20 = vld [vmem:[%s532_s5 + $0x10] sm:$0xff]  ;;  %284 = vrot.lane.b32.xlu0 %v36_v8, %s425_s28  ;;  %s296_s7 = sshll.u32 %s426_s30, 4  ;;  %s297_s7 = int_to_ptr.vmem [resolvable:$true] %s296_s7 }
  0x16   :  { %354 = vmatpush3.bf16.msra.mxu0 %v353_v4  ;;  %v362_v14 = vpack.c.bf16 %v208_v13, %v207_v12  ;;  %v305_v15 = vld [vmem:[%s529_s2] ss:$0 sm:$0xff]  ;;  %v210_v21 = vld [vmem:[%s532_s5 + $0x18] sm:$0xff]  ;;  %s395_s5 = scalar_lea.vmem %s297_s7, 128  ;;  %p400_p9 = scmp.lt.s32.totalorder %s297_s7, %s297_s7 }
  0x17   :  { %357 = vmatpush3.bf16.msra.mxu1 %v356_v7  ;;  %361 = vmatprep.subr.bf16.mxu0 %v422_v0  ;;  %v365_v22 = vpack.c.bf16 %v210_v21, %v209_v20  ;;  %v307_v23 = vld [vmem:[%s531_s4] ss:$0 sm:$0xff]  ;;  %p396_p8 = scmp.ne.s32.totalorder %s297_s7, %s395_s5  ;;  %p401_p10 = scmp.lt.s32.totalorder %s395_s5, %s395_s5 }
  0x18   :  { %358 = vmatprep.subr.bf16.mxu1 %v422_v0 }
  0x19   :  { %328 = vmatmul.mubr.msk.f32.vlgmr.msra.gmra.mrb[0].mxu0 %vm46_vm1, %v36_v8  ;;  %p402_p11 = por %p401_p10, %p400_p9 }
  0x1a   :  { %349 = vmatprep.mubr.msk.f32.mxu0 %vm423_vm0, %v424_v1  ;;  %363 = vmatpush3.bf16.msra.mxu0 %v362_v14 }
  0x1b   :  { %360 = vmatpush3.bf16.msra.mxu1 %v359_v11  ;;  %364 = vmatprep.subr.bf16.mxu0 %v422_v0  ;;  %p403_p12 = pnand %p402_p11, %p396_p8 }
  0x1e   :  { %366 = vmatpush3.bf16.msra.mxu0 %v365_v22 }
  0x87   :  { %v285_v28 = vpop.permute.xlu0 %284 }
  0xec   :  { %v116_v16 = vpop.f32.mrb[0].mxu0 }
  0xed   :  { %v117_v17 = vadd.f32 %v305_v15, %v116_v16  ;;  %v329_v18 = vpop.f32.mrb[1].mxu0 }
  0xef   :  { %v120_v19 = vmax.f32 %v117_v17, 0.0 }
  0xf1   :  { %339 = vmatmul.mubr.msk.f32.vlgmr.msra.gmra.mrb[0].mxu1 %vm132_vm2, %v120_v19 }
 0x1c4   :  { %v202_v24 = vpop.f32.mrb[0].mxu1 }
 0x1c5   :  { %v203_v25 = vadd.f32 %v307_v23, %v202_v24  ;;  %v340_v26 = vpop.f32.mrb[1].mxu1 }
 0x1c7   :  { %v206_v27 = vmax.f32 %v203_v25, 0.0 }
 0x1c9   :  { %350 = vmatmul.mubr.msk.f32.vlgmr.msra.gmra.mrb[2].mxu0 %vm132_vm2, %v206_v27 }
 0x29c   :  { %v280_v29 = vpop.f32.mrb[2].mxu0 }
 0x29d   :  { %v288_v30 = vsel %vm287_vm3, %v280_v29, %v285_v28  ;;  %v351_v31 = vpop.f32.mrb[3].mxu0 }
 0x29e   :  { %289 = vst.msk [vmem:[#allocation5] sm:$0xff] %vm46_vm1, %v288_v30 }
 0x29f   :  { %406 = shalt.err (!%p403_p12)
}
 0x2a0   :  { %s407_s9 = scalar_lea.hbm %s533_s6, 128 }
 0x2a1   :  { %p408_p13 = scmp.ne.s32.totalorder %s533_s6, %s407_s9  ;;  %p411_p0 = scmp.lt.u32.totalorder %s407_s9, %s533_s6 }
 0x2a3   :  { %p413_p1 = pnand %p411_p0, %p408_p13 }
 0x2a5   :  { %416 = shalt.err (!%p413_p1)
}
 0x2a6   :  { %299 = dma.vmem_to_hbm [thread:$0]  %s297_s7, 128, %s533_s6, [#allocation4]  }
 0x2a7   :  { %419 = dma.done.wait [#allocation4], 128  }
 0x2a8   :  { %420 = vsyncadd [#allocation4], 4294967168 }
 0x2a9   :  { %303 = vsyncpa [#allocation3], 1 }
 0x2aa   :  { %304 = vsyncpa [#allocation4], 1 }

</bundles_post_ra>
